<compile_context>
chip_gen: v7x
topology: tpu7x:2x2x1
jax: 0.10.0
libtpu: 0.0.40
codegen_flags: <defaults>
</compile_context>

<pallas_src>
import functools

import jax
import jax.numpy as jnp
from jax import lax
from jax.experimental import pallas as pl
from jax.experimental.pallas import tpu as pltpu

_LANES = 128
_SUBLANES = 8


def _round_up(x, m):
    return (x + m - 1) // m * m


def _cdiv(x, m):
    return (x + m - 1) // m


def _gfl_kernel(pred_ref, targ_ref, w_ref, loss_ref, npos_ref,
                loss_acc, npos_acc, *, beta, rows, cols, mask_rows, mask_cols):
    i = pl.program_id(0)
    j = pl.program_id(1)
    tile_r, tile_c = pred_ref.shape
    n_chunks = tile_c // _LANES

    @pl.when(j == 0)
    def _init():
        loss_acc[...] = jnp.zeros_like(loss_acc)
        npos_acc[...] = jnp.zeros_like(npos_acc)

    # Ragged-edge masks (emitted only when the true extents are not tile multiples).
    # Out-of-bounds lanes/sublanes of a partial block contain garbage, so inputs are
    # forced to p = t = 0.5 BEFORE the logs (zero loss element, finite logs, t != 1).
    row_ok = None
    if mask_rows:
        row_ok = (i * tile_r
                  + lax.broadcasted_iota(jnp.int32, (tile_r, _LANES), 0)) < rows
    lane_iota = None
    if mask_cols:
        lane_iota = lax.broadcasted_iota(jnp.int32, (tile_r, _LANES), 1)

    loss_part = jnp.zeros((tile_r, _LANES), jnp.float32)
    npos_part = jnp.zeros((tile_r, _LANES), jnp.float32)
    for c in range(n_chunks):
        c0 = c * _LANES
        # Native-dtype transport; upcast each 128-lane chunk in-kernel.
        p = pred_ref[:, c0:c0 + _LANES].astype(jnp.float32)
        t = targ_ref[:, c0:c0 + _LANES].astype(jnp.float32)

        ok = row_ok
        if mask_cols:
            col_ok = (j * tile_c + c0 + lane_iota) < cols
            ok = col_ok if ok is None else (ok & col_ok)
        if ok is not None:
            p = jnp.where(ok, p, 0.5)
            t = jnp.where(ok, t, 0.5)

        d = t - p
        # beta is a trace-time value: integer exponents never lower pow -> exp/log,
        # keeping the single EUP slot free for the two logs below.
        if beta == 2:
            scale = d * d
        elif isinstance(beta, int) and beta >= 1:
            ad = jnp.abs(d)
            scale = ad
            for _ in range(int(beta) - 1):
                scale = scale * ad
        else:
            scale = jnp.power(jnp.abs(d), beta)

        # cross-entropy term: target*log(p) + (1-target)*log(1-p)
        ce = t * jnp.log(p) + (1.0 - t) * jnp.log(1.0 - p)
        loss_part = loss_part + scale * ce
        npos_part = npos_part + (t == 1.0).astype(jnp.float32)

    # Lane-dense accumulation (pure VALU adds); no per-step cross-lane reduce and no
    # per-step sub-128-lane read-modify-write on the narrow output refs.
    loss_acc[...] += loss_part
    npos_acc[...] += npos_part

    @pl.when(j == pl.num_programs(1) - 1)
    def _finalize():
        # One cross-lane collapse + class-weight multiply + negate + narrow store
        # per row tile.
        loss_ref[...] = -(w_ref[...] * jnp.sum(loss_acc[...], axis=1, keepdims=True))
        npos_ref[...] = jnp.sum(npos_acc[...], axis=1, keepdims=True)


def generalized_focal_loss(prediction, target, cls_weights, beta=2,
                           target_block_bytes=4 * 1024 * 1024,
                           max_tile_c=2048, max_tile_r=2048):
    B, C, H, W = prediction.shape
    R, L = B * C, H * W

    # No-copy reshapes; keep native dtype (bf16 transport halves HBM traffic if the
    # model produces bf16).  Only the tiny weight vector is cast/padded.
    pred2 = prediction.reshape(R, L)
    targ2 = target.reshape(R, L)
    w2 = cls_weights.reshape(R, 1).astype(jnp.float32)

    # Sublane granularity from the transported dtypes (f32 -> 8, bf16 -> 16, 8-bit -> 32).
    def _sub(dt):
        return _SUBLANES * max(1, 4 // jnp.dtype(dt).itemsize)

    sub = max(_SUBLANES, _sub(prediction.dtype), _sub(target.dtype))
    itemsize = max(jnp.dtype(prediction.dtype).itemsize,
                   jnp.dtype(target.dtype).itemsize)

    # Column tile: split round_up(L, 128) into near-equal 128-aligned chunks of at most
    # max_tile_c lanes.  The ragged tail is handled by in-kernel masking, not padding.
    L128 = _round_up(L, _LANES)
    n_col_tiles = _cdiv(L128, max_tile_c)
    tile_c = _round_up(_cdiv(L128, n_col_tiles), _LANES)
    grid_c = _cdiv(L, tile_c)

    # Row tile: sized so each input block is <= target_block_bytes, multiple of the
    # sublane granularity, capped so per-chunk intermediates stay small.
    rows_budget = max(sub, (target_block_bytes // (itemsize * tile_c)) // sub * sub)
    rows_budget = min(rows_budget, max_tile_r)
    R_sub = _round_up(R, sub)
    tile_r = min(R_sub, rows_budget)
    # v7x megacore: make sure the parallel row axis has >= 2 tiles when possible.
    if _cdiv(R, tile_r) < 2 and R_sub > sub:
        tile_r = max(sub, _round_up(_cdiv(R_sub, 2), sub))
    grid_r = _cdiv(R, tile_r)
    Rp = grid_r * tile_r

    if Rp != R:
        # Only the tiny (R, 1) weight array is ever padded (keeps garbage weights out of
        # the final multiply for the masked rows).
        w2 = jnp.pad(w2, ((0, Rp - R), (0, 0)), constant_values=0.0)

    mask_rows = (Rp != R)
    mask_cols = (grid_c * tile_c != L)

    loss_rows, npos_rows = pl.pallas_call(
        functools.partial(_gfl_kernel, beta=beta, rows=R, cols=L,
                          mask_rows=mask_rows, mask_cols=mask_cols),
        out_shape=(
            jax.ShapeDtypeStruct((Rp, 1), jnp.float32),   # per-row weighted loss sums
            jax.ShapeDtypeStruct((Rp, 1), jnp.float32),   # per-row positive counts
        ),
        grid_spec=pltpu.PrefetchScalarGridSpec(
            num_scalar_prefetch=0,
            grid=(grid_r, grid_c),
            in_specs=[
                pl.BlockSpec((tile_r, tile_c), lambda i, j: (i, j)),
                pl.BlockSpec((tile_r, tile_c), lambda i, j: (i, j)),
                pl.BlockSpec((tile_r, 1), lambda i, j: (i, 0)),
            ],
            out_specs=(
                pl.BlockSpec((tile_r, 1), lambda i, j: (i, 0)),
                pl.BlockSpec((tile_r, 1), lambda i, j: (i, 0)),
            ),
            scratch_shapes=[
                pltpu.VMEM((tile_r, _LANES), jnp.float32),
                pltpu.VMEM((tile_r, _LANES), jnp.float32),
            ],
        ),
        compiler_params=pltpu.CompilerParams(
            dimension_semantics=("parallel", "arbitrary"),
            # 2 inputs x 2 pipeline buffers x ~4 MiB plus scratch/temps; stays under
            # v7x's 64 MiB physical VMEM, comfortable on v5e/v6e (128 MiB).
            vmem_limit_bytes=48 * 1024 * 1024,
        ),
    )(pred2, targ2, w2)

    num_positive = jnp.maximum(1.0, jnp.sum(npos_rows))
    return jnp.sum(loss_rows) / num_positive


def _reference(prediction, target, cls_weights, beta=2):
    # Pure-JAX reference mirroring the PyTorch forward.
    w = cls_weights[:, :, None, None]
    w = jnp.broadcast_to(w, prediction.shape)
    positive_index = (target == 1).astype(jnp.float32)
    num_positive = positive_index.sum()
    scale = jnp.power(jnp.abs(target - prediction), beta)
    loss = -scale * (target * jnp.log(prediction)
                     + (1 - target) * jnp.log(1 - prediction)) * w
    return loss.sum() / jnp.maximum(1.0, num_positive)


def _make_inputs(key, B, C, H, W):
    k1, k2, k3, k4 = jax.random.split(key, 4)
    # predictions strictly inside (0, 1) so log() is finite
    prediction = jax.nn.sigmoid(jax.random.normal(k1, (B, C, H, W), jnp.float32))
    # targets in [0, 1), with some exact 1.0 "positive" locations
    raw_t = jax.random.uniform(k2, (B, C, H, W), jnp.float32, 0.0, 0.95)
    pos_mask = jax.random.uniform(k3, (B, C, H, W)) > 0.8
    target = jnp.where(pos_mask, 1.0, raw_t)
    cls_weights = jax.random.uniform(k4, (B, C), jnp.float32, 0.5, 1.5)
    return prediction, target, cls_weights


if __name__ == "__main__":
    key = jax.random.PRNGKey(0)
    k_a, k_b = jax.random.split(key)

    # Aligned case: B*C = 8 rows, H*W = 256 lanes (no ragged tails, no masking emitted).
    pred, targ, w = _make_inputs(k_a, 2, 4, 16, 16)
    out = jax.block_until_ready(generalized_focal_loss(pred, targ, w, beta=2))
    ref = _reference(pred, targ, w, beta=2)
    assert jnp.allclose(out, ref, rtol=1e-5, atol=1e-5), (out, ref)

    # Ragged case: rows (6) and lanes (143) not tile multiples — exercises partial-block
    # reads with in-kernel masking instead of wrapper-side padding.
    pred, targ, w = _make_inputs(k_b, 2, 3, 13, 11)
    out = jax.block_until_ready(generalized_focal_loss(pred, targ, w, beta=2))
    ref = _reference(pred, targ, w, beta=2)
    assert jnp.allclose(out, ref, rtol=1e-5, atol=1e-5), (out, ref)

    print("KERNEL_OK")
</pallas_src>

<mosaic_0001>
module attributes {stable_mosaic.version = 11 : i64} {
  func.func @_gfl_kernel(%arg0: i32, %arg1: i32, %arg2: memref<8x256xf32, #tpu.memory_space<vmem>>, %arg3: memref<8x256xf32, #tpu.memory_space<vmem>>, %arg4: memref<8x1xf32, #tpu.memory_space<vmem>>, %arg5: memref<8x1xf32, #tpu.memory_space<vmem>>, %arg6: memref<8x1xf32, #tpu.memory_space<vmem>>, %arg7: memref<8x128xf32, #tpu.memory_space<vmem>>, %arg8: memref<8x128xf32, #tpu.memory_space<vmem>>) attributes {dimension_semantics = [#tpu.dimension_semantics<parallel>, #tpu.dimension_semantics<arbitrary>], iteration_bounds = array<i64: 1, 1>, scalar_prefetch = 0 : i64, scratch_operands = 2 : i64, tpu.core_type = #tpu.core_type<tc>, window_params = [{transform_indices = @transform_0, window_bounds = array<i64: 8, 256>}, {transform_indices = @transform_1, window_bounds = array<i64: 8, 256>}, {transform_indices = @transform_2, window_bounds = array<i64: 8, 1>}, {transform_indices = @transform_3, window_bounds = array<i64: 8, 1>}, {transform_indices = @transform_4, window_bounds = array<i64: 8, 1>}]} {
    %c0_i32 = arith.constant 0 : i32
    %0 = arith.cmpi eq, %arg1, %c0_i32 : i32
    %1 = arith.extui %0 : i1 to i32
    %c0_i32_0 = arith.constant 0 : i32
    %2 = arith.cmpi ne, %1, %c0_i32_0 : i32
    scf.if %2 {
      %cst_24 = arith.constant 0.000000e+00 : f32
      %54 = vector.broadcast %cst_24 : f32 to vector<8x128xf32>
      %c0_25 = arith.constant 0 : index
      %c0_26 = arith.constant 0 : index
      %55 = vector.load %arg7[%c0_25, %c0_26] : memref<8x128xf32, #tpu.memory_space<vmem>>, vector<8x128xf32>
      tpu.vector_store %arg7[%c0_25, %c0_26], %54 {strides = array<i32>} : memref<8x128xf32, #tpu.memory_space<vmem>>, vector<8x128xf32>,
      %cst_27 = arith.constant 0.000000e+00 : f32
      %56 = vector.broadcast %cst_27 : f32 to vector<8x128xf32>
      %c0_28 = arith.constant 0 : index
      %c0_29 = arith.constant 0 : index
      %57 = vector.load %arg8[%c0_28, %c0_29] : memref<8x128xf32, #tpu.memory_space<vmem>>, vector<8x128xf32>
      tpu.vector_store %arg8[%c0_28, %c0_29], %56 {strides = array<i32>} : memref<8x128xf32, #tpu.memory_space<vmem>>, vector<8x128xf32>,
    } else {
    }
    %cst = arith.constant 0.000000e+00 : f32
    %3 = vector.broadcast %cst : f32 to vector<8x128xf32>
    %cst_1 = arith.constant 0.000000e+00 : f32
    %4 = vector.broadcast %cst_1 : f32 to vector<8x128xf32>
    %c0 = arith.constant 0 : index
    %c0_2 = arith.constant 0 : index
    %5 = vector.load %arg2[%c0, %c0_2] : memref<8x256xf32, #tpu.memory_space<vmem>>, vector<8x128xf32>
    %c0_3 = arith.constant 0 : index
    %c0_4 = arith.constant 0 : index
    %6 = vector.load %arg3[%c0_3, %c0_4] : memref<8x256xf32, #tpu.memory_space<vmem>>, vector<8x128xf32>
    %7 = arith.subf %6, %5 : vector<8x128xf32>
    %8 = arith.mulf %7, %7 : vector<8x128xf32>
    %9 = math.log %5 : vector<8x128xf32>
    %10 = arith.mulf %6, %9 : vector<8x128xf32>
    %cst_5 = arith.constant 1.000000e+00 : f32
    %11 = vector.broadcast %cst_5 : f32 to vector<8x128xf32>
    %12 = arith.subf %11, %6 : vector<8x128xf32>
    %cst_6 = arith.constant 1.000000e+00 : f32
    %13 = vector.broadcast %cst_6 : f32 to vector<8x128xf32>
    %14 = arith.subf %13, %5 : vector<8x128xf32>
    %15 = math.log %14 : vector<8x128xf32>
    %16 = arith.mulf %12, %15 : vector<8x128xf32>
    %17 = arith.addf %10, %16 : vector<8x128xf32>
    %18 = arith.mulf %8, %17 : vector<8x128xf32>
    %19 = arith.addf %3, %18 : vector<8x128xf32>
    %cst_7 = arith.constant 1.000000e+00 : f32
    %20 = vector.broadcast %cst_7 : f32 to vector<8x128xf32>
    %21 = arith.cmpf oeq, %6, %20 : vector<8x128xf32>
    %22 = arith.extui %21 : vector<8x128xi1> to vector<8x128xi32>
    %23 = arith.sitofp %22 : vector<8x128xi32> to vector<8x128xf32>
    %24 = arith.addf %4, %23 : vector<8x128xf32>
    %c0_8 = arith.constant 0 : index
    %c128 = arith.constant 128 : index
    %25 = vector.load %arg2[%c0_8, %c128] : memref<8x256xf32, #tpu.memory_space<vmem>>, vector<8x128xf32>
    %c0_9 = arith.constant 0 : index
    %c128_10 = arith.constant 128 : index
    %26 = vector.load %arg3[%c0_9, %c128_10] : memref<8x256xf32, #tpu.memory_space<vmem>>, vector<8x128xf32>
    %27 = arith.subf %26, %25 : vector<8x128xf32>
    %28 = arith.mulf %27, %27 : vector<8x128xf32>
    %29 = math.log %25 : vector<8x128xf32>
    %30 = arith.mulf %26, %29 : vector<8x128xf32>
    %cst_11 = arith.constant 1.000000e+00 : f32
    %31 = vector.broadcast %cst_11 : f32 to vector<8x128xf32>
    %32 = arith.subf %31, %26 : vector<8x128xf32>
    %cst_12 = arith.constant 1.000000e+00 : f32
    %33 = vector.broadcast %cst_12 : f32 to vector<8x128xf32>
    %34 = arith.subf %33, %25 : vector<8x128xf32>
    %35 = math.log %34 : vector<8x128xf32>
    %36 = arith.mulf %32, %35 : vector<8x128xf32>
    %37 = arith.addf %30, %36 : vector<8x128xf32>
    %38 = arith.mulf %28, %37 : vector<8x128xf32>
    %39 = arith.addf %19, %38 : vector<8x128xf32>
    %cst_13 = arith.constant 1.000000e+00 : f32
    %40 = vector.broadcast %cst_13 : f32 to vector<8x128xf32>
    %41 = arith.cmpf oeq, %26, %40 : vector<8x128xf32>
    %42 = arith.extui %41 : vector<8x128xi1> to vector<8x128xi32>
    %43 = arith.sitofp %42 : vector<8x128xi32> to vector<8x128xf32>
    %44 = arith.addf %24, %43 : vector<8x128xf32>
    %c0_14 = arith.constant 0 : index
    %c0_15 = arith.constant 0 : index
    %45 = vector.load %arg7[%c0_14, %c0_15] : memref<8x128xf32, #tpu.memory_space<vmem>>, vector<8x128xf32>
    %46 = arith.addf %45, %39 : vector<8x128xf32>
    %c0_16 = arith.constant 0 : index
    %c0_17 = arith.constant 0 : index
    %47 = vector.load %arg7[%c0_16, %c0_17] : memref<8x128xf32, #tpu.memory_space<vmem>>, vector<8x128xf32>
    tpu.vector_store %arg7[%c0_16, %c0_17], %46 {strides = array<i32>} : memref<8x128xf32, #tpu.memory_space<vmem>>, vector<8x128xf32>,
    %c0_18 = arith.constant 0 : index
    %c0_19 = arith.constant 0 : index
    %48 = vector.load %arg8[%c0_18, %c0_19] : memref<8x128xf32, #tpu.memory_space<vmem>>, vector<8x128xf32>
    %49 = arith.addf %48, %44 : vector<8x128xf32>
    %c0_20 = arith.constant 0 : index
    %c0_21 = arith.constant 0 : index
    %50 = vector.load %arg8[%c0_20, %c0_21] : memref<8x128xf32, #tpu.memory_space<vmem>>, vector<8x128xf32>
    tpu.vector_store %arg8[%c0_20, %c0_21], %49 {strides = array<i32>} : memref<8x128xf32, #tpu.memory_space<vmem>>, vector<8x128xf32>,
    %c0_i32_22 = arith.constant 0 : i32
    %51 = arith.cmpi eq, %arg1, %c0_i32_22 : i32
    %52 = arith.extui %51 : i1 to i32
    %c0_i32_23 = arith.constant 0 : i32
    %53 = arith.cmpi ne, %52, %c0_i32_23 : i32
    scf.if %53 {
      %c0_24 = arith.constant 0 : index
      %c0_25 = arith.constant 0 : index
      %54 = vector.load %arg4[%c0_24, %c0_25] : memref<8x1xf32, #tpu.memory_space<vmem>>, vector<8x1xf32>
      %c0_26 = arith.constant 0 : index
      %c0_27 = arith.constant 0 : index
      %55 = vector.load %arg7[%c0_26, %c0_27] : memref<8x128xf32, #tpu.memory_space<vmem>>, vector<8x128xf32>
      %cst_28 = arith.constant dense<0.000000e+00> : vector<8xf32>
      %56 = vector.multi_reduction <add>, %55, %cst_28 [1] : vector<8x128xf32> to vector<8xf32>
      %57 = vector.shape_cast %56 : vector<8xf32> to vector<8x1xf32>
      %58 = arith.mulf %54, %57 : vector<8x1xf32>
      %cst_29 = arith.constant 0.000000e+00 : f32
      %59 = vector.broadcast %cst_29 : f32 to vector<8x1xf32>
      %60 = arith.subf %59, %58 : vector<8x1xf32>
      %c0_30 = arith.constant 0 : index
      %c0_31 = arith.constant 0 : index
      %61 = vector.load %arg5[%c0_30, %c0_31] : memref<8x1xf32, #tpu.memory_space<vmem>>, vector<8x1xf32>
      tpu.vector_store %arg5[%c0_30, %c0_31], %60 {strides = array<i32>} : memref<8x1xf32, #tpu.memory_space<vmem>>, vector<8x1xf32>,
      %c0_32 = arith.constant 0 : index
      %c0_33 = arith.constant 0 : index
      %62 = vector.load %arg8[%c0_32, %c0_33] : memref<8x128xf32, #tpu.memory_space<vmem>>, vector<8x128xf32>
      %cst_34 = arith.constant dense<0.000000e+00> : vector<8xf32>
      %63 = vector.multi_reduction <add>, %62, %cst_34 [1] : vector<8x128xf32> to vector<8xf32>
      %64 = vector.shape_cast %63 : vector<8xf32> to vector<8x1xf32>
      %c0_35 = arith.constant 0 : index
      %c0_36 = arith.constant 0 : index
      %65 = vector.load %arg6[%c0_35, %c0_36] : memref<8x1xf32, #tpu.memory_space<vmem>>, vector<8x1xf32>
      tpu.vector_store %arg6[%c0_35, %c0_36], %64 {strides = array<i32>} : memref<8x1xf32, #tpu.memory_space<vmem>>, vector<8x1xf32>,
    } else {
    }
    return
  }
  func.func @transform_0(%arg0: i32, %arg1: i32) -> (i32, i32) {
    %c0_i32 = arith.constant 0 : i32
    return %arg0, %arg1 : i32, i32
  }
  func.func @transform_1(%arg0: i32, %arg1: i32) -> (i32, i32) {
    %c0_i32 = arith.constant 0 : i32
    return %arg0, %arg1 : i32, i32
  }
  func.func @transform_2(%arg0: i32, %arg1: i32) -> (i32, i32) {
    %c0_i32 = arith.constant 0 : i32
    %c0_i32_0 = arith.constant 0 : i32
    return %arg0, %c0_i32 : i32, i32
  }
  func.func @transform_3(%arg0: i32, %arg1: i32) -> (i32, i32) {
    %c0_i32 = arith.constant 0 : i32
    %c0_i32_0 = arith.constant 0 : i32
    return %arg0, %c0_i32 : i32, i32
  }
  func.func @transform_4(%arg0: i32, %arg1: i32) -> (i32, i32) {
    %c0_i32 = arith.constant 0 : i32
    %c0_i32_0 = arith.constant 0 : i32
    return %arg0, %c0_i32 : i32, i32
  }
}

</mosaic_0001>

<bundles_post_ra>
// kernel: tpu_custom_call.1
= control target key start
LH: loop header
LB: loop body
LE: loop exit
PB: predicated region body
PF: predicated region fallthrough
CT: control target
= control target key end

     0   :  { %10 = vsyncpa [#allocation5], 0  ;;  %s237_s0 = inlined_call_operand.hbm [shape: f32[8,256], index: 0, kind: input, shape index: {}]   ;;  %s238_s1 = inlined_call_operand.hbm [shape: f32[8,256], index: 1, kind: input, shape index: {}]   ;;  %s239_s2 = inlined_call_operand.vmem [shape: f32[8,1], index: 2, kind: input, shape index: {}]   ;;  %s240_s3 = inlined_call_operand.vmem [shape: f32[8,1], index: 3, kind: output, shape index: {0}]   ;;  %s241_s4 = inlined_call_operand.vmem [shape: f32[8,1], index: 4, kind: output, shape index: {1}]  }
   0x1   :  { %11 = vsyncpa [#allocation7], 0  ;;  %s176_s15 = smov [#allocation4]   ;;  %s177_s17 = smov [#allocation6]  }
   0x2   :  { %s18_s16 = sshll.u32 %s176_s15, 4  ;;  %s28_s18 = sshll.u32 %s177_s17, 4  ;;  %s19_s16 = int_to_ptr.vmem [resolvable:$true] %s18_s16  ;;  %s29_s18 = int_to_ptr.vmem [resolvable:$true] %s28_s18 }
   0x3   :  { %s128_s21 = scalar_lea.hbm %s237_s0, 256 }
   0x4   :  { %p129_p0 = scmp.ne.s32.totalorder %s237_s0, %s128_s21  ;;  %p132_p1 = scmp.lt.u32.totalorder %s128_s21, %s237_s0 }
   0x6   :  { %p134_p2 = pnand %p132_p1, %p129_p0 }
   0x8   :  { %137 = shalt.err (!%p134_p2)
}
   0x9   :  { %s138_s26 = scalar_lea.vmem %s19_s16, 256  ;;  %p143_p4 = scmp.lt.s32.totalorder %s19_s16, %s19_s16 }
   0xa   :  { %p139_p3 = scmp.ne.s32.totalorder %s19_s16, %s138_s26  ;;  %p144_p5 = scmp.lt.s32.totalorder %s138_s26, %s138_s26 }
   0xc   :  { %p145_p6 = por %p144_p5, %p143_p4 }
   0xe   :  { %p146_p7 = pnand %p145_p6, %p139_p3 }
  0x10   :  { %149 = shalt.err (!%p146_p7)
}
  0x11   :  { %21 = dma.hbm_to_vmem [thread:$0]  %s237_s0, 256, %s19_s16, [#allocation5]  }
  0x12   :  { %s150_s5 = scalar_lea.hbm %s238_s1, 256 }
  0x13   :  { %p151_p8 = scmp.ne.s32.totalorder %s238_s1, %s150_s5  ;;  %p154_p9 = scmp.lt.u32.totalorder %s150_s5, %s238_s1 }
  0x15   :  { %p156_p10 = pnand %p154_p9, %p151_p8 }
  0x17   :  { %159 = shalt.err (!%p156_p10)
}
  0x18   :  { %s160_s10 = scalar_lea.vmem %s29_s18, 256  ;;  %p165_p12 = scmp.lt.s32.totalorder %s29_s18, %s29_s18 }
  0x19   :  { %p161_p11 = scmp.ne.s32.totalorder %s29_s18, %s160_s10  ;;  %p166_p13 = scmp.lt.s32.totalorder %s160_s10, %s160_s10 }
  0x1b   :  { %p167_p0 = por %p166_p13, %p165_p12 }
  0x1d   :  { %p168_p1 = pnand %p167_p0, %p161_p11 }
  0x1f   :  { %171 = shalt.err (!%p168_p1)
}
  0x20   :  { %31 = dma.hbm_to_vmem [thread:$0]  %s238_s1, 256, %s29_s18, [#allocation7]  }
  0x21   :  { %172 = dma.done.wait [#allocation5], 256  }
  0x22   :  { %173 = vsyncadd [#allocation5], 4294967040 }
  0x23   :  { %174 = dma.done.wait [#allocation7], 256  }
  0x24   :  { %175 = vsyncadd [#allocation7], 4294967040  ;;  %v46_v0 = vld [vmem:[#allocation4] sm:$0xff]  ;;  %v65_v1 = vld [vmem:[#allocation4 + $0x8] sm:$0xff]  ;;  %v178_v28 = vmov 0.0   ;;  %vm99_vm2 = vcmask 7168  }
  0x25   :  { %120 = vlog2.f32 %v46_v0  ;;  %v54_v2 = vsub.f32 1.0, %v46_v0  ;;  %v73_v3 = vsub.f32 1.0, %v65_v1  ;;  %v47_v4 = vld [vmem:[#allocation6] sm:$0xff]  ;;  %v66_v5 = vld [vmem:[#allocation6 + $0x8] sm:$0xff]  ;;  %v93_v33 = vld [vmem:[%s239_s2] sm:$0xff] }
  0x26   :  { %122 = vlog2.f32 %v65_v1  ;;  %v48_v8 = vsub.f32 %v47_v4, %v46_v0  ;;  %v53_v10 = vsub.f32 1.0, %v47_v4  ;;  %v67_v12 = vsub.f32 %v66_v5, %v65_v1 }
  0x27   :  { %124 = vlog2.f32 %v54_v2  ;;  %v72_v14 = vsub.f32 1.0, %v66_v5  ;;  %vm61_vm0 = vcmp.eq.f32.partialorder %v47_v4, 1.0  ;;  %vm80_vm1 = vcmp.eq.f32.partialorder %v66_v5, 1.0 }
  0x28   :  { %126 = vlog2.f32 %v73_v3  ;;  %v49_v20 = vmul.f32 %v48_v8, %v48_v8  ;;  %v68_v22 = vmul.f32 %v67_v12, %v67_v12  ;;  %v115_v29 = vsel %vm61_vm0, 1.0, %v178_v28 }
  0x29   :  { %v116_v30 = vsel %vm80_vm1, 1.0, %v178_v28 }
  0x2a   :  { %v83_v32 = vadd.f32 %v116_v30, %v115_v29 }
  0x2f   :  { %v121_v6 = vpop.eup %120 }
  0x30   :  { %v123_v7 = vpop.eup %122  ;;  %v51_v9 = vmul.f32 0.6931472, %v121_v6 }
  0x31   :  { %v125_v11 = vpop.eup %124  ;;  %v70_v13 = vmul.f32 0.6931472, %v123_v7 }
  0x32   :  { %v127_v15 = vpop.eup %126  ;;  %v52_v16 = vmul.f32 %v51_v9, %v47_v4  ;;  %v56_v17 = vmul.f32 0.6931472, %v125_v11 }
  0x33   :  { %v71_v18 = vmul.f32 %v70_v13, %v66_v5  ;;  %v75_v19 = vmul.f32 0.6931472, %v127_v15 }
  0x34   :  { %v57_v21 = vmul.f32 %v56_v17, %v53_v10 }
  0x35   :  { %v76_v23 = vmul.f32 %v75_v19, %v72_v14 }
  0x36   :  { %v58_v24 = vadd.f32 %v57_v21, %v52_v16 }
  0x37   :  { %v77_v25 = vadd.f32 %v76_v23, %v71_v18 }
  0x38   :  { %v59_v26 = vmul.f32 %v58_v24, %v49_v20 }
  0x39   :  { %v78_v27 = vmul.f32 %v77_v25, %v68_v22 }
  0x3b   :  { %v79_v31 = vadd.f32 %v78_v27, %v59_v26 }
  0x3d   :  { %95 = vadd.xlane.f32.xlu0 %v79_v31 }
  0x41   :  { %102 = vadd.xlane.f32.xlu0 %v83_v32 }
  0xca   :  { %v96_v34 = vpop.xlane.xlu0 %95 }
  0xcb   :  { %v97_v35 = vmul.f32 %v96_v34, %v93_v33 }
  0xcd   :  { %v98_v36 = vsub.f32 0.0, %v97_v35 }
  0xce   :  { %v103_v37 = vpop.xlane.xlu0 %102 }
  0xcf   :  { %100 = vst.msk [vmem:[%s240_s3] sm:$0xff] %vm99_vm2, %v98_v36  ;;  %104 = vst.msk [vmem:[%s241_s4] sm:$0xff] %vm99_vm2, %v103_v37 }
  0xd0   :  { %113 = vsyncpa [#allocation5], 1 }
  0xd1   :  { %114 = vsyncpa [#allocation7], 1 }

</bundles_post_ra>
